<compile_context>
chip_gen: v5e
topology: v5e:2x2
jax: 0.10.0
libtpu: 0.0.40
codegen_flags: <defaults>
</compile_context>

<pallas_src>
import numpy as np
import jax
import jax.numpy as jnp
from jax import lax
from jax.experimental import pallas as pl
from jax.experimental.pallas import tpu as pltpu


# --------------------------------------------------------------------------
# Fused kernel: conv3x3 (+width upsample folded) -> height upsample -> * conv1x1
# --------------------------------------------------------------------------
def _seb_fused_kernel(xw_ref, low_ref, w3u_ref, b3u_ref, uh_ref,
                      w1k_ref, b1k_ref, out_ref):
    # xw_ref : (1, H+2, (W+2)*Cin) f32   padded high input, W*Cin folded on lanes
    # low_ref: (1, Ho, Wo*Clow)    bf16  low input, Wo*Clow folded on lanes
    # w3u_ref: (3, (W+2)*Cin, Wo*Cout) bf16  banded conv3x3 weight with the
    #                                        width-upsample folded in
    # b3u_ref: (1, Wo*Cout) f32          conv3x3 bias tiled over Wo
    # uh_ref : (Ho, H) bf16              row-interp matrix (align_corners=True)
    # w1k_ref: (Wo*Clow, Wo*Cout) bf16   I_Wo (x) w1 (block-diag conv1x1 weight)
    # b1k_ref: (1, Wo*Cout) f32          conv1x1 bias tiled over Wo
    # out_ref: (1, Ho, Wo*Cout) f32      lane-dense output (128 lanes here)
    H = uh_ref.shape[1]

    # conv3x3 + width upsample: 3 accumulating bf16 matmuls, f32 accumulation.
    acc = jnp.dot(xw_ref[0, 0:H, :].astype(jnp.bfloat16), w3u_ref[0],
                  preferred_element_type=jnp.float32)
    for dy in (1, 2):                                   # static unroll, static slices
        acc += jnp.dot(xw_ref[0, dy:dy + H, :].astype(jnp.bfloat16), w3u_ref[dy],
                       preferred_element_type=jnp.float32)

    # height upsample (align_corners=True); rows of Uh sum to 1 so the conv
    # bias can be added once afterwards, in f32.
    up = jnp.dot(uh_ref[...], acc.astype(jnp.bfloat16),
                 preferred_element_type=jnp.float32) + b3u_ref[...]     # (Ho, Wo*Cout)

    # conv1x1(low) in the same folded layout, fused multiply, one dense store.
    z = jnp.dot(low_ref[0], w1k_ref[...],
                preferred_element_type=jnp.float32) + b1k_ref[...]      # (Ho, Wo*Cout)
    out_ref[0] = up * z


def _seb_pallas(xw, low_w, w3u, b3u, uh, w1k, b1k):
    N, Hp, band = xw.shape
    Ho, WoClow = low_w.shape[1], low_w.shape[2]
    WoCout = w1k.shape[1]
    return pl.pallas_call(
        _seb_fused_kernel,
        out_shape=jax.ShapeDtypeStruct((N, Ho, WoCout), jnp.float32),
        grid=(N,),
        in_specs=[
            pl.BlockSpec((1, Hp, band), lambda n: (n, 0, 0)),
            pl.BlockSpec((1, Ho, WoClow), lambda n: (n, 0, 0)),
            pl.BlockSpec(w3u.shape, lambda n: (0, 0, 0)),
            pl.BlockSpec(b3u.shape, lambda n: (0, 0)),
            pl.BlockSpec(uh.shape, lambda n: (0, 0)),
            pl.BlockSpec(w1k.shape, lambda n: (0, 0)),
            pl.BlockSpec(b1k.shape, lambda n: (0, 0)),
        ],
        out_specs=pl.BlockSpec((1, Ho, WoCout), lambda n: (n, 0, 0)),
        compiler_params=pltpu.CompilerParams(
            dimension_semantics=("parallel",),
            vmem_limit_bytes=64 * 1024 * 1024),
    )(xw, low_w, w3u, b3u, uh, w1k, b1k)


# --------------------------------------------------------------------------
# Host-side constant folding (once per parameter set) + forward glue
# --------------------------------------------------------------------------
def bilinear_matrix(n_in, n_out):
    """align_corners=True interpolation matrix (matches nn.UpsamplingBilinear2d)."""
    M = np.zeros((n_out, n_in), dtype=np.float32)
    for o in range(n_out):
        src = o * (n_in - 1) / (n_out - 1) if n_out > 1 else 0.0
        i0 = min(int(np.floor(src)), n_in - 1)
        i1 = min(i0 + 1, n_in - 1)
        frac = src - i0
        M[o, i0] += 1.0 - frac
        M[o, i1] += frac
    return M


def _banded_conv3x3_weight(w3_hwio, W):
    """(3,3,Cin,Cout) -> (3, (W+2)*Cin, W*Cout) per-dy banded matrices."""
    Cin, Cout = w3_hwio.shape[2], w3_hwio.shape[3]
    w3 = np.asarray(w3_hwio, np.float32)
    t = np.zeros((3, W + 2, Cin, W, Cout), np.float32)
    for dy in range(3):
        for dx in range(3):
            for w in range(W):
                t[dy, w + dx, :, w, :] = w3[dy, dx]
    return t.reshape(3, (W + 2) * Cin, W * Cout)


def fold_params(params, H, W):
    """Fold weights once per parameter set (hoisted out of the per-call path)."""
    w3, b3, w1, b1 = params["w3"], params["b3"], params["w1"], params["b1"]
    Cout = w3.shape[-1]
    Ho, Wo = 2 * H, 2 * W

    w3b = _banded_conv3x3_weight(w3, W)                                   # (3,(W+2)Cin, W*Cout)
    uw = bilinear_matrix(W, Wo)                                           # (Wo, W)
    uwk = np.kron(uw.T, np.eye(Cout, dtype=np.float32))                   # (W*Cout, Wo*Cout)
    w3u = np.matmul(w3b, uwk)                                             # fold width upsample
    b3u = np.tile(np.asarray(b3, np.float32), Wo).reshape(1, Wo * Cout)
    uh = bilinear_matrix(H, Ho)                                           # (Ho, H)
    w1k = np.kron(np.eye(Wo, dtype=np.float32), np.asarray(w1, np.float32))
    b1k = np.tile(np.asarray(b1, np.float32), Wo).reshape(1, Wo * Cout)

    return {
        "w3u": jnp.asarray(w3u, jnp.bfloat16),
        "b3u": jnp.asarray(b3u, jnp.float32),
        "uh": jnp.asarray(uh, jnp.bfloat16),
        "w1k": jnp.asarray(w1k, jnp.bfloat16),
        "b1k": jnp.asarray(b1k, jnp.float32),
    }


def seb_forward(high_x, low_x, folded):
    """high_x: (N,Cin,H,W) NCHW; low_x: (N,Clow,2H,2W) NCHW -> (N,Cout,2H,2W)."""
    N, Cin, H, W = high_x.shape
    _, Clow, Ho, Wo = low_x.shape
    Cout = folded["b1k"].shape[1] // Wo

    # Boundary layout work only: NCHW -> NHWC, pad, fold W*C onto the lane axis.
    xpad = jnp.pad(jnp.transpose(high_x, (0, 2, 3, 1)),
                   ((0, 0), (1, 1), (1, 1), (0, 0)))
    xw = xpad.reshape(N, H + 2, (W + 2) * Cin)                      # f32 (cast per-tap in kernel)
    low_w = jnp.transpose(low_x, (0, 2, 3, 1)).reshape(N, Ho, Wo * Clow).astype(jnp.bfloat16)

    out_w = _seb_pallas(xw, low_w, folded["w3u"], folded["b3u"], folded["uh"],
                        folded["w1k"], folded["b1k"])               # (N, Ho, Wo*Cout)
    out = out_w.reshape(N, Ho, Wo, Cout)
    return jnp.transpose(out, (0, 3, 1, 2))                         # back to NCHW


# --------------------------------------------------------------------------
# Pure-JAX reference
# --------------------------------------------------------------------------
def reference(high_x, low_x, params):
    w3, b3, w1, b1 = params["w3"], params["b3"], params["w1"], params["b1"]
    N, _, H, W = high_x.shape
    hn = jnp.transpose(high_x, (0, 2, 3, 1))
    y = lax.conv_general_dilated(
        hn, w3, (1, 1), ((1, 1), (1, 1)),
        dimension_numbers=("NHWC", "HWIO", "NHWC")) + b3
    uh = jnp.asarray(bilinear_matrix(H, 2 * H))
    uw = jnp.asarray(bilinear_matrix(W, 2 * W))
    up = jnp.einsum("oh,nhwc->nowc", uh, y)
    up = jnp.einsum("pw,nowc->nopc", uw, up)
    ln = jnp.transpose(low_x, (0, 2, 3, 1))
    z = lax.conv_general_dilated(
        ln, w1[None, None, :, :], (1, 1), ((0, 0), (0, 0)),
        dimension_numbers=("NHWC", "HWIO", "NHWC")) + b1
    return jnp.transpose(up * z, (0, 3, 1, 2))


if __name__ == "__main__":
    # high feature map is half the spatial resolution of the low feature map.
    N, HIGH_IN, LOW_IN, OUT = 2, 4, 8, 8
    H = W = 8                       # high spatial; low is (2H, 2W) = (16, 16)

    key = jax.random.PRNGKey(0)
    k1, k2, k3, k4, k5, k6 = jax.random.split(key, 6)

    # PyTorch conv weight layouts converted:
    #   conv3x3: (OUT, HIGH_IN, 3, 3) -> HWIO (3, 3, HIGH_IN, OUT)
    #   conv1x1: (OUT, LOW_IN, 1, 1)  -> (LOW_IN, OUT)
    w3_oihw = jax.random.normal(k1, (OUT, HIGH_IN, 3, 3), jnp.float32) * 0.1
    b3 = jax.random.normal(k2, (OUT,), jnp.float32) * 0.1
    w1_oihw = jax.random.normal(k3, (OUT, LOW_IN, 1, 1), jnp.float32) * 0.1
    b1 = jax.random.normal(k4, (OUT,), jnp.float32) * 0.1
    params = {
        "w3": jnp.transpose(w3_oihw, (2, 3, 1, 0)),   # HWIO
        "b3": b3,
        "w1": w1_oihw[:, :, 0, 0].T,                  # (LOW_IN, OUT)
        "b1": b1,
    }

    high_x = jax.random.normal(k5, (N, HIGH_IN, H, W), jnp.float32)
    low_x = jax.random.normal(k6, (N, LOW_IN, 2 * H, 2 * W), jnp.float32)

    # Folded constants built ONCE per parameter set (hoisted out of the call path).
    folded = fold_params(params, H, W)
    seb = jax.jit(seb_forward)

    out = jax.block_until_ready(seb(high_x, low_x, folded))
    ref = jax.block_until_ready(reference(high_x, low_x, params))

    assert out.shape == (N, OUT, 2 * H, 2 * W), out.shape
    # bf16 MXU operands with f32 accumulation -> relaxed tolerance.
    assert np.allclose(np.asarray(out), np.asarray(ref), atol=3e-2, rtol=3e-2), \
        float(np.abs(np.asarray(out) - np.asarray(ref)).max())

    print("KERNEL_OK")
</pallas_src>

<mosaic_0001>
module attributes {stable_mosaic.version = 11 : i64} {
  func.func @_seb_fused_kernel(%arg0: i32, %arg1: memref<1x10x40xf32, #tpu.memory_space<vmem>>, %arg2: memref<1x16x128xbf16, #tpu.memory_space<vmem>>, %arg3: memref<3x40x128xbf16, #tpu.memory_space<vmem>>, %arg4: memref<1x128xf32, #tpu.memory_space<vmem>>, %arg5: memref<16x8xbf16, #tpu.memory_space<vmem>>, %arg6: memref<128x128xbf16, #tpu.memory_space<vmem>>, %arg7: memref<1x128xf32, #tpu.memory_space<vmem>>, %arg8: memref<1x16x128xf32, #tpu.memory_space<vmem>>) attributes {dimension_semantics = [#tpu.dimension_semantics<parallel>], iteration_bounds = array<i64: 2>, scalar_prefetch = 0 : i64, scratch_operands = 0 : i64, tpu.core_type = #tpu.core_type<tc>, window_params = [{transform_indices = @transform_0, window_bounds = array<i64: 1, 10, 40>}, {transform_indices = @transform_1, window_bounds = array<i64: 1, 16, 128>}, {pipeline_mode = #tpu.pipeline_mode<synchronous>, transform_indices = @transform_2, window_bounds = array<i64: 3, 40, 128>}, {pipeline_mode = #tpu.pipeline_mode<synchronous>, transform_indices = @transform_3, window_bounds = array<i64: 1, 128>}, {pipeline_mode = #tpu.pipeline_mode<synchronous>, transform_indices = @transform_4, window_bounds = array<i64: 16, 8>}, {pipeline_mode = #tpu.pipeline_mode<synchronous>, transform_indices = @transform_5, window_bounds = array<i64: 128, 128>}, {pipeline_mode = #tpu.pipeline_mode<synchronous>, transform_indices = @transform_6, window_bounds = array<i64: 1, 128>}, {transform_indices = @transform_7, window_bounds = array<i64: 1, 16, 128>}]} {
    %c0 = arith.constant 0 : index
    %c0_0 = arith.constant 0 : index
    %c0_1 = arith.constant 0 : index
    %0 = vector.load %arg1[%c0, %c0_0, %c0_1] : memref<1x10x40xf32, #tpu.memory_space<vmem>>, vector<1x8x40xf32>
    %1 = vector.shape_cast %0 : vector<1x8x40xf32> to vector<8x40xf32>
    %2 = arith.truncf %1 : vector<8x40xf32> to vector<8x40xbf16>
    %c0_2 = arith.constant 0 : index
    %c0_3 = arith.constant 0 : index
    %c0_4 = arith.constant 0 : index
    %3 = vector.load %arg3[%c0_2, %c0_3, %c0_4] : memref<3x40x128xbf16, #tpu.memory_space<vmem>>, vector<1x40x128xbf16>
    %4 = vector.shape_cast %3 : vector<1x40x128xbf16> to vector<40x128xbf16>
    %cst = arith.constant dense<0.000000e+00> : vector<8x128xf32>
    %5 = tpu.matmul %2, %4, %cst {dimension_numbers = #tpu.dot_dimension_numbers<[1], [0], [0], [1], [0, 0, 1, 1], [], []>} : vector<8x40xbf16>, vector<40x128xbf16>, vector<8x128xf32> -> vector<8x128xf32>
    %c0_5 = arith.constant 0 : index
    %c1 = arith.constant 1 : index
    %c0_6 = arith.constant 0 : index
    %6 = vector.load %arg1[%c0_5, %c1, %c0_6] : memref<1x10x40xf32, #tpu.memory_space<vmem>>, vector<1x8x40xf32>
    %7 = vector.shape_cast %6 : vector<1x8x40xf32> to vector<8x40xf32>
    %8 = arith.truncf %7 : vector<8x40xf32> to vector<8x40xbf16>
    %c1_7 = arith.constant 1 : index
    %c0_8 = arith.constant 0 : index
    %c0_9 = arith.constant 0 : index
    %9 = vector.load %arg3[%c1_7, %c0_8, %c0_9] : memref<3x40x128xbf16, #tpu.memory_space<vmem>>, vector<1x40x128xbf16>
    %10 = vector.shape_cast %9 : vector<1x40x128xbf16> to vector<40x128xbf16>
    %cst_10 = arith.constant dense<0.000000e+00> : vector<8x128xf32>
    %11 = tpu.matmul %8, %10, %cst_10 {dimension_numbers = #tpu.dot_dimension_numbers<[1], [0], [0], [1], [0, 0, 1, 1], [], []>} : vector<8x40xbf16>, vector<40x128xbf16>, vector<8x128xf32> -> vector<8x128xf32>
    %12 = arith.addf %5, %11 : vector<8x128xf32>
    %c0_11 = arith.constant 0 : index
    %c2 = arith.constant 2 : index
    %c0_12 = arith.constant 0 : index
    %13 = vector.load %arg1[%c0_11, %c2, %c0_12] : memref<1x10x40xf32, #tpu.memory_space<vmem>>, vector<1x8x40xf32>
    %14 = vector.shape_cast %13 : vector<1x8x40xf32> to vector<8x40xf32>
    %15 = arith.truncf %14 : vector<8x40xf32> to vector<8x40xbf16>
    %c2_13 = arith.constant 2 : index
    %c0_14 = arith.constant 0 : index
    %c0_15 = arith.constant 0 : index
    %16 = vector.load %arg3[%c2_13, %c0_14, %c0_15] : memref<3x40x128xbf16, #tpu.memory_space<vmem>>, vector<1x40x128xbf16>
    %17 = vector.shape_cast %16 : vector<1x40x128xbf16> to vector<40x128xbf16>
    %cst_16 = arith.constant dense<0.000000e+00> : vector<8x128xf32>
    %18 = tpu.matmul %15, %17, %cst_16 {dimension_numbers = #tpu.dot_dimension_numbers<[1], [0], [0], [1], [0, 0, 1, 1], [], []>} : vector<8x40xbf16>, vector<40x128xbf16>, vector<8x128xf32> -> vector<8x128xf32>
    %19 = arith.addf %12, %18 : vector<8x128xf32>
    %c0_17 = arith.constant 0 : index
    %c0_18 = arith.constant 0 : index
    %20 = vector.load %arg5[%c0_17, %c0_18] : memref<16x8xbf16, #tpu.memory_space<vmem>>, vector<16x8xbf16>
    %21 = arith.truncf %19 : vector<8x128xf32> to vector<8x128xbf16>
    %cst_19 = arith.constant dense<0.000000e+00> : vector<16x128xf32>
    %22 = tpu.matmul %20, %21, %cst_19 {dimension_numbers = #tpu.dot_dimension_numbers<[1], [0], [0], [1], [0, 0, 1, 1], [], []>} : vector<16x8xbf16>, vector<8x128xbf16>, vector<16x128xf32> -> vector<16x128xf32>
    %c0_20 = arith.constant 0 : index
    %c0_21 = arith.constant 0 : index
    %23 = vector.load %arg4[%c0_20, %c0_21] : memref<1x128xf32, #tpu.memory_space<vmem>>, vector<1x128xf32>
    %24 = vector.broadcast %23 : vector<1x128xf32> to vector<16x128xf32>
    %25 = arith.addf %22, %24 : vector<16x128xf32>
    %c0_22 = arith.constant 0 : index
    %c0_23 = arith.constant 0 : index
    %c0_24 = arith.constant 0 : index
    %26 = vector.load %arg2[%c0_22, %c0_23, %c0_24] : memref<1x16x128xbf16, #tpu.memory_space<vmem>>, vector<1x16x128xbf16>
    %27 = vector.shape_cast %26 : vector<1x16x128xbf16> to vector<16x128xbf16>
    %c0_25 = arith.constant 0 : index
    %c0_26 = arith.constant 0 : index
    %28 = vector.load %arg6[%c0_25, %c0_26] : memref<128x128xbf16, #tpu.memory_space<vmem>>, vector<128x128xbf16>
    %cst_27 = arith.constant dense<0.000000e+00> : vector<16x128xf32>
    %29 = tpu.matmul %27, %28, %cst_27 {dimension_numbers = #tpu.dot_dimension_numbers<[1], [0], [0], [1], [0, 0, 1, 1], [], []>} : vector<16x128xbf16>, vector<128x128xbf16>, vector<16x128xf32> -> vector<16x128xf32>
    %c0_28 = arith.constant 0 : index
    %c0_29 = arith.constant 0 : index
    %30 = vector.load %arg7[%c0_28, %c0_29] : memref<1x128xf32, #tpu.memory_space<vmem>>, vector<1x128xf32>
    %31 = vector.broadcast %30 : vector<1x128xf32> to vector<16x128xf32>
    %32 = arith.addf %29, %31 : vector<16x128xf32>
    %33 = arith.mulf %25, %32 : vector<16x128xf32>
    %c0_30 = arith.constant 0 : index
    %c0_31 = arith.constant 0 : index
    %c0_32 = arith.constant 0 : index
    %34 = vector.load %arg8[%c0_30, %c0_31, %c0_32] : memref<1x16x128xf32, #tpu.memory_space<vmem>>, vector<1x16x128xf32>
    %35 = vector.shape_cast %34 : vector<1x16x128xf32> to vector<16x128xf32>
    %36 = vector.shape_cast %33 : vector<16x128xf32> to vector<1x16x128xf32>
    tpu.vector_store %arg8[%c0_30, %c0_31, %c0_32], %36 {strides = array<i32>} : memref<1x16x128xf32, #tpu.memory_space<vmem>>, vector<1x16x128xf32>,
    return
  }
  func.func @transform_0(%arg0: i32) -> (i32, i32, i32) {
    %c0_i32 = arith.constant 0 : i32
    %c0_i32_0 = arith.constant 0 : i32
    %c0_i32_1 = arith.constant 0 : i32
    return %arg0, %c0_i32, %c0_i32_0 : i32, i32, i32
  }
  func.func @transform_1(%arg0: i32) -> (i32, i32, i32) {
    %c0_i32 = arith.constant 0 : i32
    %c0_i32_0 = arith.constant 0 : i32
    %c0_i32_1 = arith.constant 0 : i32
    return %arg0, %c0_i32, %c0_i32_0 : i32, i32, i32
  }
  func.func @transform_2(%arg0: i32) -> (i32, i32, i32) {
    %c0_i32 = arith.constant 0 : i32
    %c0_i32_0 = arith.constant 0 : i32
    %c0_i32_1 = arith.constant 0 : i32
    %c0_i32_2 = arith.constant 0 : i32
    return %c0_i32, %c0_i32_0, %c0_i32_1 : i32, i32, i32
  }
  func.func @transform_3(%arg0: i32) -> (i32, i32) {
    %c0_i32 = arith.constant 0 : i32
    %c0_i32_0 = arith.constant 0 : i32
    %c0_i32_1 = arith.constant 0 : i32
    return %c0_i32, %c0_i32_0 : i32, i32
  }
  func.func @transform_4(%arg0: i32) -> (i32, i32) {
    %c0_i32 = arith.constant 0 : i32
    %c0_i32_0 = arith.constant 0 : i32
    %c0_i32_1 = arith.constant 0 : i32
    return %c0_i32, %c0_i32_0 : i32, i32
  }
  func.func @transform_5(%arg0: i32) -> (i32, i32) {
    %c0_i32 = arith.constant 0 : i32
    %c0_i32_0 = arith.constant 0 : i32
    %c0_i32_1 = arith.constant 0 : i32
    return %c0_i32, %c0_i32_0 : i32, i32
  }
  func.func @transform_6(%arg0: i32) -> (i32, i32) {
    %c0_i32 = arith.constant 0 : i32
    %c0_i32_0 = arith.constant 0 : i32
    %c0_i32_1 = arith.constant 0 : i32
    return %c0_i32, %c0_i32_0 : i32, i32
  }
  func.func @transform_7(%arg0: i32) -> (i32, i32, i32) {
    %c0_i32 = arith.constant 0 : i32
    %c0_i32_0 = arith.constant 0 : i32
    %c0_i32_1 = arith.constant 0 : i32
    return %arg0, %c0_i32, %c0_i32_0 : i32, i32, i32
  }
}

</mosaic_0001>

<bundles_post_ra>
// kernel: seb_forward.1
= control target key start
LH: loop header
LB: loop body
LE: loop exit
PB: predicated region body
PF: predicated region fallthrough
CT: control target
= control target key end

     0   :  { %s790_s24 = smov 0   ;;  %s882_s0 = inlined_call_operand.vmem [shape: f32[2,10,40], index: 0, kind: input, shape index: {}]   ;;  %s883_s1 = inlined_call_operand.vmem [shape: bf16[2,16,128], index: 1, kind: input, shape index: {}]   ;;  %s884_s2 = inlined_call_operand.vmem [shape: bf16[3,40,128], index: 2, kind: input, shape index: {}]   ;;  %s885_s3 = inlined_call_operand.vmem [shape: f32[1,128], index: 3, kind: input, shape index: {}]   ;;  %s886_s4 = inlined_call_operand.vmem [shape: bf16[16,8], index: 4, kind: input, shape index: {}]   ;;  %s887_s5 = inlined_call_operand.vmem [shape: bf16[128,128], index: 5, kind: input, shape index: {}]   ;;  %s888_s6 = inlined_call_operand.vmem [shape: f32[1,128], index: 6, kind: input, shape index: {}]   ;;  %s889_s7 = inlined_call_operand.vmem [shape: f32[2,16,128], index: 7, kind: output, shape index: {}]  }
   0x1 LB: > { %s622_s25 = sadd.s32 4294967295, %s748_s24   ;;  %p626_p0 = scmp.ge.s32.totalorder %s748_s24, 1  ;;  %s748_s24 = sphi %s790_s24, %s17_s24  }
   0x2   : > { %p247_p1 = scmp.lt.s32.totalorder %s748_s24, 3 }
   0x4   : > { %p248_p2 = pnand %p626_p0, %p247_p1 }
   0x5   : > { %p284_p3 = scmp.lt.s32.totalorder (!%p248_p2), %s622_s25, 1 }
   0x6   : > { %251 = sbr.rel (%p248_p2) target bundleno = 308 (0x134), region = 48 }
   0xb   : > { %v637_v0 = vld [vmem:[%s884_s2 + $0x24] sm:$0xf]  ;;  %v306_v1 = vld [vmem:[%s884_s2 + $0x10] sm:$0xf]  ;;  %v660_v4 = vld [vmem:[%s884_s2 + $0x38] sm:$0xf] }
   0xc   : > { %v324_v2 = vunpack.c.l.b16 %v637_v0  ;;  %v360_v3 = vunpack.c.l.b16 %v306_v1  ;;  %vm334_vm0 = vcmask 1043456   ;;  %v402_v5 = vunpack.c.l.b16 %v660_v4  ;;  %s891_s25 = smov (!%p284_p3, %s622_s25), 1  ;;  %v731_v8 = vld [vmem:[%s887_s5 + $0x38] sm:$0xff]  ;;  %v730_v12 = vld [vmem:[%s887_s5 + $0x30] sm:$0xff]  ;;  %v717_v15 = vld [vmem:[%s884_s2 + $0x8] sm:$0xff] }
   0xd   : > { %s713_s11 = sshll.u32 %s891_s25, 4  ;;  %537 = vmatpush.bf16.msra.mxu3 %v731_v8  ;;  %v719_v14 = vld [vmem:[%s884_s2 + $0x1c] sm:$0xff]  ;;  %v721_v16 = vld [vmem:[%s884_s2 + $0x30] sm:$0xff]  ;;  %v729_v18 = vld [vmem:[%s887_s5 + $0x28] sm:$0xff]  ;;  %vm330_vm1 = vcmask 326656   ;;  %s714_s19 = sshll.u32 %s891_s25, 3 }
   0xe   : > { %v327_v6 = vpack.c.b16 %v324_v2, %v324_v2  ;;  %v363_v7 = vpack.c.b16 %v360_v3, %v360_v3  ;;  %v405_v9 = vpack.c.b16 %v402_v5, %v402_v5  ;;  %s288_s22 = scalar_lea.vmem %s882_s0, %s713_s11  ;;  %v718_v17 = vld [vmem:[%s884_s2 + $0x14] sm:$0xff]  ;;  %v716_v19 = vld [vmem:[%s884_s2] sm:$0xff]  ;;  %v720_v22 = vld [vmem:[%s884_s2 + $0x28] sm:$0xff]  ;;  %s293_s26 = scalar_lea.vmem %s883_s1, %s714_s19  ;;  %vm440_vm2 = vcmask 64512  }
   0xf   : > { %v307_v20 = vld [vmem:[%s288_s22 + $0x1] sm:$0xff]  ;;  %v727_v28 = vld [vmem:[%s887_s5 + $0x18] sm:$0xff]  ;;  %v726_v29 = vld [vmem:[%s887_s5 + $0x10] sm:$0xff]  ;;  %s298_s13 = scalar_lea.vmem %s889_s7, %s713_s11 }
  0x10   : > { %v336_v10 = vsel %vm334_vm0, %v327_v6, 0  ;;  %v370_v11 = vsel %vm334_vm0, %v363_v7, 0  ;;  %v412_v13 = vsel %vm334_vm0, %v405_v9, 0  ;;  %v300_v21 = vld [vmem:[%s288_s22] sm:$0xff]  ;;  %v308_v24 = vpack.c.bf16 %v307_v20, %v307_v20  ;;  %v725_v30 = vld [vmem:[%s887_s5 + $0x8] sm:$0xff] }
  0x11   : > { %343 = vmatpush.bf16.msra.mxu0 %v336_v10  ;;  %377 = vmatpush.bf16.msra.mxu1 %v370_v11  ;;  %v385_v23 = vld [vmem:[%s288_s22 + $0x2] sm:$0xff]  ;;  %v301_v25 = vpack.c.bf16 %v300_v21, %v300_v21  ;;  %v741_v44 = vld [vmem:[%s888_s6] ss:$0 sm:$0xff] }
  0x12   : > { %419 = vmatpush.bf16.msra.mxu2 %v412_v13  ;;  %538 = vmatpush.bf16.msra.mxu3 %v730_v12  ;;  %v386_v26 = vpack.c.bf16 %v385_v23, %v385_v23  ;;  %v728_v27 = vld [vmem:[%s887_s5 + $0x20] sm:$0xff] }
  0x13   : > { %v724_v31 = vld [vmem:[%s887_s5] sm:$0xff] }
  0x14   : > { %v723_v32 = vld [vmem:[%s293_s26] sm:$0xff] }
  0x15   : > { %344 = vmatpush.bf16.msra.mxu0 %v719_v14  ;;  %378 = vmatpush.bf16.msra.mxu1 %v717_v15  ;;  %v722_v42 = vld [vmem:[%s886_s4] sm:$0xff] }
  0x16   : > { %420 = vmatpush.bf16.msra.mxu2 %v721_v16  ;;  %539 = vmatpush.bf16.msra.mxu3 %v729_v18  ;;  %v740_v46 = vld [vmem:[%s885_s3] ss:$0 sm:$0xff] }
  0x19   : > { %345 = vmatpush.bf16.msra.mxu0 %v718_v17  ;;  %379 = vmatpush.bf16.msra.mxu1 %v716_v19 }
  0x1a   : > { %421 = vmatpush.bf16.msra.mxu2 %v720_v22  ;;  %540 = vmatpush.bf16.msra.mxu3 %v728_v27 }
  0x1c   : > { %646 = vmatmul.msk.bf16.vlgmr.msra.gmra.mxu0 %vm330_vm1, %v308_v24  ;;  %655 = vmatmul.msk.bf16.vlgmr.msra.gmra.mxu1 %vm330_vm1, %v301_v25 }
  0x1d   : > { %669 = vmatmul.msk.bf16.vlgmr.msra.gmra.mxu2 %vm330_vm1, %v386_v26 }
  0x1e   : > { %541 = vmatpush.bf16.msra.mxu3 %v727_v28 }
  0x22   : > { %542 = vmatpush.bf16.msra.mxu3 %v726_v29 }
  0x26   : > { %543 = vmatpush.bf16.msra.mxu3 %v725_v30 }
  0x2a   : > { %544 = vmatpush.bf16.msra.mxu3 %v724_v31 }
  0x2d   : > { %545 = vmatmul.bf16.vlgmr.msra.gmra.mxu3 %v723_v32 }
  0x99   : > { %v347_v33 = vpop.f32.mrf.mxu0  ;;  %v381_v34 = vpop.f32.mrf.mxu1 }
  0x9a   : > { %v382_v35 = vadd.f32 %v381_v34, %v347_v33 }
  0xa0   : > { %v423_v36 = vpop.f32.mrf.mxu2 }
  0xa1   : > { %v427_v37 = vadd.f32 %v423_v36, %v382_v35  ;;  %v349_v38 = vpop.f32.mrf.mxu0  ;;  %v383_v39 = vpop.f32.mrf.mxu1 }
  0xa3   : > { %v430_v40 = vpack.c.bf16 %v427_v37, %v427_v37 }
  0xa5   : > { %v445_v41 = vsel %vm334_vm0, %v430_v40, 0 }
  0xa6   : > { %454 = vmatpush.bf16.msrb.mxu0 %v445_v41 }
  0xa8   : > { %v425_v43 = vpop.f32.mrf.mxu2 }
  0xa9   : > { %674 = vmatmul.msk.bf16.vlgmr.msrb.gmra.mxu0 %vm440_vm2, %v722_v42 }
  0xb0   : > { %v546_v45 = vpop.f32.mrf.mxu3 }
  0xb1   : > { %v547_v47 = vadd.f32 %v741_v44, %v546_v45 }
  0xb8   : > { %v548_v51 = vpop.f32.mrf.mxu3 }
  0xb9   : > { %v549_v54 = vadd.f32 %v741_v44, %v548_v51 }
 0x126   : > { %v456_v48 = vpop.f32.mrf.mxu0 }
 0x127   : > { %v457_v49 = vadd.f32 %v740_v46, %v456_v48 }
 0x129   : > { %v551_v50 = vmul.f32 %v547_v47, %v457_v49 }
 0x12b   : > { %553 = vst [vmem:[%s298_s13] sm:$0xff] %v551_v50 }
 0x12e   : > { %v458_v52 = vpop.f32.mrf.mxu0 }
 0x12f   : > { %v459_v53 = vadd.f32 %v740_v46, %v458_v52 }
 0x131   : > { %v552_v55 = vmul.f32 %v549_v54, %v459_v53 }
 0x133   : > { %554 = vst [vmem:[%s298_s13 + $0x8] sm:$0xff] %v552_v55 }
 0x134 PF: > { %s17_s24 = sadd.s32 1, %s748_s24  }
 0x135   : > { %p14_p4 = scmp.ge.s32.totalorder %s17_s24, 4  }
 0x137   :  { %16 = sbr.rel (!%p14_p4) target bundleno = 1 (0x1), region = 83 }

</bundles_post_ra>
